<compile_context>
chip_gen: v5e
topology: v5e:2x2
jax: 0.10.0
libtpu: 0.0.40
codegen_flags: <defaults>
</compile_context>

<pallas_src>
import numpy as np
import jax
import jax.numpy as jnp
from jax.experimental import pallas as pl
from jax.experimental.pallas import tpu as pltpu

# ---- static config (small shapes consistent with the module) ----
B = 2               # batch
G_DIM = 16          # global_input_dim
I_DIM = 16          # instance_input_dim
IN_DIM = G_DIM + I_DIM
H_DIM = 32          # hypernet hidden_dim
S = 8               # backbone sequence length
D_IN = 8            # placeholder linear in_features
D_OUT = 4           # placeholder linear out_features
OI = D_OUT * D_IN   # flat weight-delta size (32)
P = OI + D_OUT      # peft_param_count (36)
LANES = 128         # lane-dense width
P_PAD = 128         # padded delta width
CLAMP_HYPER = 0.05  # HierarchicalHypernetwork.clamp_range
CLAMP_MODEL = 0.01  # PEFTHypernetModel.clamp_range (net clamp = min of the two)

# ---- packed parameter slab layout (all region starts are multiples of 8 sublanes) ----
R_W1G = 0            # (G_DIM, 128): W1 rows for global features, lanes [:H_DIM]
R_W1I = 16           # (I_DIM, 128): W1 rows for instance features, lanes [:H_DIM]
R_B1 = 32            # (1, 128): b1, lanes [:H_DIM]
R_W2 = 40            # (128, 128): W2 padded (rows >= H_DIM and lanes >= P are zero)
R_B2 = 168           # (1, 128): b2 padded
R_E = 176            # (D_IN, 128): E[i, o*D_IN+i] = 1 (gathers x[., p % D_IN] into lane p)
R_BIND = 184         # (1, 128): 1.0 at lanes [OI:P] (bias-delta indicator)
R_SELW = 192         # (128, 128): SELW_aug — weight flatten + bias delta -> out lane o
R_WBT = 320          # (D_IN, 128): theta_bar_W^T, lanes [:D_OUT]
R_BBAR = 328         # (1, 128): theta_bar_b, lanes [:D_OUT]
SLAB_ROWS = 336


# --------------------------------------------------------------------------
# Fused kernel: hypernet MLP + clamp + theta_bar+delta splice + backbone linear.
# Single program (no grid); everything stays resident in VMEM; all stores are
# lane-dense (128-wide, unmasked).
# --------------------------------------------------------------------------
def _fused_kernel(g_ref, inst_ref, x_ref, slab_ref, delta_ref, out_ref):
    f32 = jnp.float32

    # ---- hypernetwork MLP (feature concat folded into two dots on W1 row blocks) ----
    h = (jnp.dot(g_ref[...], slab_ref[R_W1G:R_W1G + G_DIM, :],
                 preferred_element_type=f32)
         + jnp.dot(inst_ref[...], slab_ref[R_W1I:R_W1I + I_DIM, :],
                   preferred_element_type=f32)
         + slab_ref[R_B1:R_B1 + 1, :])
    h = jnp.maximum(h, 0.0)                       # (B, 128); lanes >= H_DIM are exact zeros

    # output layer (zero-padded to 128 lanes) + collapsed clamp (+-0.05 then +-0.01 == +-0.01)
    d = (jnp.dot(h, slab_ref[R_W2:R_W2 + P_PAD, :], preferred_element_type=f32)
         + slab_ref[R_B2:R_B2 + 1, :])
    d = jnp.clip(d, -CLAMP_MODEL, CLAMP_MODEL)
    delta_ref[...] = d                            # (B, 128) lane-dense store; pad lanes == 0

    # ---- per-sample broadcast of delta over the sequence: (B,128) -> (B*S,128) ----
    d_rep = jnp.concatenate(
        [jnp.broadcast_to(d[b:b + 1, :], (S, P_PAD)) for b in range(B)], axis=0)

    x2 = x_ref[...]                               # (B*S, D_IN)

    # gather x into flat-param lanes, inject 1s at the bias-delta lanes:
    #   xe[bs, o*D_IN+i] = x[bs, i]     xe[bs, OI+o] = 1.0     xe[bs, >=P] = 0
    xe = (jnp.dot(x2, slab_ref[R_E:R_E + D_IN, :], preferred_element_type=f32)
          + slab_ref[R_BIND:R_BIND + 1, :])

    # out = x @ theta_bar_W^T  +  (weight & bias delta splice via SELW_aug)  +  theta_bar_b
    y = (jnp.dot(x2, slab_ref[R_WBT:R_WBT + D_IN, :], preferred_element_type=f32)
         + jnp.dot(xe * d_rep, slab_ref[R_SELW:R_SELW + P_PAD, :],
                   preferred_element_type=f32)
         + slab_ref[R_BBAR:R_BBAR + 1, :])
    out_ref[...] = y                              # (B*S, 128) lane-dense store; pad lanes == 0


_VMEM_SPEC = pl.BlockSpec(memory_space=pltpu.MemorySpace.VMEM)


# --------------------------------------------------------------------------
# One-time setup: pack every static parameter + selection constant into a single
# (SLAB_ROWS, 128) f32 slab (one DMA instead of eight tiny ones).
# --------------------------------------------------------------------------
def build_param_slab(w1, b1, w2, b2, w_bar, b_bar):
    w1 = np.asarray(w1, np.float32)
    b1 = np.asarray(b1, np.float32).reshape(-1)
    w2 = np.asarray(w2, np.float32)
    b2 = np.asarray(b2, np.float32).reshape(-1)
    w_bar = np.asarray(w_bar, np.float32)
    b_bar = np.asarray(b_bar, np.float32).reshape(-1)

    slab = np.zeros((SLAB_ROWS, LANES), np.float32)
    slab[R_W1G:R_W1G + G_DIM, :H_DIM] = w1[:G_DIM]
    slab[R_W1I:R_W1I + I_DIM, :H_DIM] = w1[G_DIM:]
    slab[R_B1, :H_DIM] = b1
    slab[R_W2:R_W2 + H_DIM, :P] = w2
    slab[R_B2, :P] = b2

    # E: gathers x[., p % D_IN] into flat-param lane p (p < OI)
    slab[R_E:R_E + D_IN, :OI] = np.tile(np.eye(D_IN, dtype=np.float32), (1, D_OUT))
    # bias-delta indicator row
    slab[R_BIND, OI:P] = 1.0
    # SELW_aug: row-major weight flatten -> out lane o, plus bias delta -> out lane o
    for o in range(D_OUT):
        slab[R_SELW + o * D_IN:R_SELW + (o + 1) * D_IN, o] = 1.0
        slab[R_SELW + OI + o, o] = 1.0

    # frozen placeholder state theta_bar, pre-transposed / lane-padded
    slab[R_WBT:R_WBT + D_IN, :D_OUT] = w_bar.T
    slab[R_BBAR, :D_OUT] = b_bar
    return jnp.asarray(slab)


# --------------------------------------------------------------------------
# Wrapper: PEFTHypernetModel.forward (single pallas_call; returns padded outputs,
# the trailing slices are deferred to the use site — pad lanes are exact zeros).
# --------------------------------------------------------------------------
@jax.jit
def peft_hypernet_forward(global_features, instance_features, x_in, param_slab):
    x2 = x_in.reshape(B * S, D_IN)          # row-major flatten: layout no-op
    delta_pad, out_pad = pl.pallas_call(
        _fused_kernel,
        out_shape=(jax.ShapeDtypeStruct((B, P_PAD), jnp.float32),
                   jax.ShapeDtypeStruct((B * S, LANES), jnp.float32)),
        in_specs=[_VMEM_SPEC] * 4,
        out_specs=(_VMEM_SPEC, _VMEM_SPEC),
    )(global_features, instance_features, x2, param_slab)
    return delta_pad, out_pad


if __name__ == "__main__":
    key = jax.random.PRNGKey(0)
    ks = jax.random.split(key, 9)

    # example inputs
    global_features = jax.random.normal(ks[0], (B, G_DIM), jnp.float32)
    instance_features = jax.random.normal(ks[1], (B, I_DIM), jnp.float32)
    x_in = jax.random.normal(ks[2], (B, S, D_IN), jnp.float32)

    # hypernet params (nn.Linear-equivalent, pre-transposed to [in, out])
    w1 = jax.random.normal(ks[3], (IN_DIM, H_DIM), jnp.float32) / jnp.sqrt(IN_DIM)
    b1 = jax.random.normal(ks[4], (1, H_DIM), jnp.float32) * 0.01
    w2 = jax.random.normal(ks[5], (H_DIM, P), jnp.float32) / jnp.sqrt(H_DIM)
    b2 = jax.random.normal(ks[6], (1, P), jnp.float32) * 0.01

    # frozen placeholder state theta_bar (weight [D_OUT, D_IN], bias [1, D_OUT])
    w_bar = jax.random.normal(ks[7], (D_OUT, D_IN), jnp.float32) * 0.1
    b_bar = jax.random.normal(ks[8], (1, D_OUT), jnp.float32) * 0.1

    # one-time setup: all static params + selection constants in one slab
    param_slab = build_param_slab(w1, b1, w2, b2, w_bar, b_bar)

    delta_pad, out_pad = peft_hypernet_forward(global_features, instance_features,
                                               x_in, param_slab)
    jax.block_until_ready((delta_pad, out_pad))

    # lazy slices at the use site (pad lanes are exact zeros)
    delta = delta_pad[:, :P]
    out = out_pad[:, :D_OUT].reshape(B, S, D_OUT)

    # pure-JAX reference of the same semantics (with both original clamps)
    xf = jnp.concatenate([global_features, instance_features], axis=-1)
    d_ref = jnp.maximum(xf @ w1 + b1, 0.0) @ w2 + b2
    d_ref = jnp.clip(jnp.clip(d_ref, -CLAMP_HYPER, CLAMP_HYPER),
                     -CLAMP_MODEL, CLAMP_MODEL)
    w_eff = w_bar[None] + d_ref[:, :OI].reshape(B, D_OUT, D_IN)
    b_eff = b_bar + d_ref[:, OI:]
    out_ref = jnp.einsum("bsd,bod->bso", x_in, w_eff) + b_eff[:, None, :]

    assert jnp.allclose(delta, d_ref, atol=1e-5), "delta mismatch"
    assert jnp.allclose(out, out_ref, atol=1e-5), "output mismatch"
    assert jnp.allclose(delta_pad[:, P:], 0.0), "delta pad lanes not zero"
    assert jnp.allclose(out_pad[:, D_OUT:], 0.0), "output pad lanes not zero"
    print("KERNEL_OK")
</pallas_src>

<mosaic_0001>
module attributes {stable_mosaic.version = 11 : i64} {
  func.func @_fused_kernel(%arg0: memref<2x16xf32, #tpu.memory_space<vmem>>, %arg1: memref<2x16xf32, #tpu.memory_space<vmem>>, %arg2: memref<16x8xf32, #tpu.memory_space<vmem>>, %arg3: memref<336x128xf32, #tpu.memory_space<vmem>>, %arg4: memref<2x128xf32, #tpu.memory_space<vmem>>, %arg5: memref<16x128xf32, #tpu.memory_space<vmem>>) attributes {dimension_semantics = [], scalar_prefetch = 0 : i64, scratch_operands = 0 : i64, tpu.core_type = #tpu.core_type<tc>} {
    %c0 = arith.constant 0 : index
    %c0_0 = arith.constant 0 : index
    %0 = vector.load %arg0[%c0, %c0_0] : memref<2x16xf32, #tpu.memory_space<vmem>>, vector<2x16xf32>
    %c0_1 = arith.constant 0 : index
    %c0_2 = arith.constant 0 : index
    %1 = vector.load %arg3[%c0_1, %c0_2] : memref<336x128xf32, #tpu.memory_space<vmem>>, vector<16x128xf32>
    %cst = arith.constant dense<0.000000e+00> : vector<2x128xf32>
    %2 = tpu.matmul %0, %1, %cst {dimension_numbers = #tpu.dot_dimension_numbers<[1], [0], [0], [1], [0, 0, 1, 1], [], []>} : vector<2x16xf32>, vector<16x128xf32>, vector<2x128xf32> -> vector<2x128xf32>
    %c0_3 = arith.constant 0 : index
    %c0_4 = arith.constant 0 : index
    %3 = vector.load %arg1[%c0_3, %c0_4] : memref<2x16xf32, #tpu.memory_space<vmem>>, vector<2x16xf32>
    %c16 = arith.constant 16 : index
    %c0_5 = arith.constant 0 : index
    %4 = vector.load %arg3[%c16, %c0_5] : memref<336x128xf32, #tpu.memory_space<vmem>>, vector<16x128xf32>
    %cst_6 = arith.constant dense<0.000000e+00> : vector<2x128xf32>
    %5 = tpu.matmul %3, %4, %cst_6 {dimension_numbers = #tpu.dot_dimension_numbers<[1], [0], [0], [1], [0, 0, 1, 1], [], []>} : vector<2x16xf32>, vector<16x128xf32>, vector<2x128xf32> -> vector<2x128xf32>
    %6 = arith.addf %2, %5 : vector<2x128xf32>
    %c32 = arith.constant 32 : index
    %c0_7 = arith.constant 0 : index
    %7 = vector.load %arg3[%c32, %c0_7] : memref<336x128xf32, #tpu.memory_space<vmem>>, vector<1x128xf32>
    %8 = vector.broadcast %7 : vector<1x128xf32> to vector<2x128xf32>
    %9 = arith.addf %6, %8 : vector<2x128xf32>
    %cst_8 = arith.constant 0.000000e+00 : f32
    %10 = vector.broadcast %cst_8 : f32 to vector<2x128xf32>
    %11 = arith.maximumf %9, %10 : vector<2x128xf32>
    %c40 = arith.constant 40 : index
    %c0_9 = arith.constant 0 : index
    %12 = vector.load %arg3[%c40, %c0_9] : memref<336x128xf32, #tpu.memory_space<vmem>>, vector<128x128xf32>
    %cst_10 = arith.constant dense<0.000000e+00> : vector<2x128xf32>
    %13 = tpu.matmul %11, %12, %cst_10 {dimension_numbers = #tpu.dot_dimension_numbers<[1], [0], [0], [1], [0, 0, 1, 1], [], []>} : vector<2x128xf32>, vector<128x128xf32>, vector<2x128xf32> -> vector<2x128xf32>
    %c168 = arith.constant 168 : index
    %c0_11 = arith.constant 0 : index
    %14 = vector.load %arg3[%c168, %c0_11] : memref<336x128xf32, #tpu.memory_space<vmem>>, vector<1x128xf32>
    %15 = vector.broadcast %14 : vector<1x128xf32> to vector<2x128xf32>
    %16 = arith.addf %13, %15 : vector<2x128xf32>
    %cst_12 = arith.constant -0.00999999977 : f32
    %cst_13 = arith.constant 0.00999999977 : f32
    %17 = vector.broadcast %cst_12 : f32 to vector<2x128xf32>
    %18 = arith.maximumf %17, %16 : vector<2x128xf32>
    %19 = vector.broadcast %cst_13 : f32 to vector<2x128xf32>
    %20 = arith.minimumf %19, %18 : vector<2x128xf32>
    %c0_14 = arith.constant 0 : index
    %c0_15 = arith.constant 0 : index
    %21 = vector.load %arg4[%c0_14, %c0_15] : memref<2x128xf32, #tpu.memory_space<vmem>>, vector<2x128xf32>
    tpu.vector_store %arg4[%c0_14, %c0_15], %20 {strides = array<i32>} : memref<2x128xf32, #tpu.memory_space<vmem>>, vector<2x128xf32>,
    %22 = vector.extract_strided_slice %20 {offsets = [0, 0], sizes = [1, 128], strides = [1, 1]} : vector<2x128xf32> to vector<1x128xf32>
    %23 = vector.shape_cast %22 : vector<1x128xf32> to vector<1x128xf32>
    %24 = vector.broadcast %23 : vector<1x128xf32> to vector<8x128xf32>
    %25 = vector.extract_strided_slice %20 {offsets = [1, 0], sizes = [1, 128], strides = [1, 1]} : vector<2x128xf32> to vector<1x128xf32>
    %26 = vector.shape_cast %25 : vector<1x128xf32> to vector<1x128xf32>
    %27 = vector.broadcast %26 : vector<1x128xf32> to vector<8x128xf32>
    %28 = tpu.concatenate %24, %27 in 0 : vector<8x128xf32>, vector<8x128xf32> -> vector<16x128xf32>
    %c0_16 = arith.constant 0 : index
    %c0_17 = arith.constant 0 : index
    %29 = vector.load %arg2[%c0_16, %c0_17] : memref<16x8xf32, #tpu.memory_space<vmem>>, vector<16x8xf32>
    %c176 = arith.constant 176 : index
    %c0_18 = arith.constant 0 : index
    %30 = vector.load %arg3[%c176, %c0_18] : memref<336x128xf32, #tpu.memory_space<vmem>>, vector<8x128xf32>
    %cst_19 = arith.constant dense<0.000000e+00> : vector<16x128xf32>
    %31 = tpu.matmul %29, %30, %cst_19 {dimension_numbers = #tpu.dot_dimension_numbers<[1], [0], [0], [1], [0, 0, 1, 1], [], []>} : vector<16x8xf32>, vector<8x128xf32>, vector<16x128xf32> -> vector<16x128xf32>
    %c184 = arith.constant 184 : index
    %c0_20 = arith.constant 0 : index
    %32 = vector.load %arg3[%c184, %c0_20] : memref<336x128xf32, #tpu.memory_space<vmem>>, vector<1x128xf32>
    %33 = vector.broadcast %32 : vector<1x128xf32> to vector<16x128xf32>
    %34 = arith.addf %31, %33 : vector<16x128xf32>
    %c320 = arith.constant 320 : index
    %c0_21 = arith.constant 0 : index
    %35 = vector.load %arg3[%c320, %c0_21] : memref<336x128xf32, #tpu.memory_space<vmem>>, vector<8x128xf32>
    %cst_22 = arith.constant dense<0.000000e+00> : vector<16x128xf32>
    %36 = tpu.matmul %29, %35, %cst_22 {dimension_numbers = #tpu.dot_dimension_numbers<[1], [0], [0], [1], [0, 0, 1, 1], [], []>} : vector<16x8xf32>, vector<8x128xf32>, vector<16x128xf32> -> vector<16x128xf32>
    %37 = arith.mulf %34, %28 : vector<16x128xf32>
    %c192 = arith.constant 192 : index
    %c0_23 = arith.constant 0 : index
    %38 = vector.load %arg3[%c192, %c0_23] : memref<336x128xf32, #tpu.memory_space<vmem>>, vector<128x128xf32>
    %cst_24 = arith.constant dense<0.000000e+00> : vector<16x128xf32>
    %39 = tpu.matmul %37, %38, %cst_24 {dimension_numbers = #tpu.dot_dimension_numbers<[1], [0], [0], [1], [0, 0, 1, 1], [], []>} : vector<16x128xf32>, vector<128x128xf32>, vector<16x128xf32> -> vector<16x128xf32>
    %40 = arith.addf %36, %39 : vector<16x128xf32>
    %c328 = arith.constant 328 : index
    %c0_25 = arith.constant 0 : index
    %41 = vector.load %arg3[%c328, %c0_25] : memref<336x128xf32, #tpu.memory_space<vmem>>, vector<1x128xf32>
    %42 = vector.broadcast %41 : vector<1x128xf32> to vector<16x128xf32>
    %43 = arith.addf %40, %42 : vector<16x128xf32>
    %c0_26 = arith.constant 0 : index
    %c0_27 = arith.constant 0 : index
    %44 = vector.load %arg5[%c0_26, %c0_27] : memref<16x128xf32, #tpu.memory_space<vmem>>, vector<16x128xf32>
    tpu.vector_store %arg5[%c0_26, %c0_27], %43 {strides = array<i32>} : memref<16x128xf32, #tpu.memory_space<vmem>>, vector<16x128xf32>,
    return
  }
}

</mosaic_0001>

<bundles_post_ra>
// kernel: peft_hypernet_forward.1
= control target key start
LH: loop header
LB: loop body
LE: loop exit
PB: predicated region body
PF: predicated region fallthrough
CT: control target
= control target key end

     0   :  { %11 = vsyncpa [#allocation3], 0  ;;  %s583_s0 = inlined_call_operand.hbm [shape: f32[2,16], index: 0, kind: input, shape index: {}]   ;;  %s584_s1 = inlined_call_operand.hbm [shape: f32[2,16], index: 1, kind: input, shape index: {}]   ;;  %s585_s2 = inlined_call_operand.hbm [shape: f32[16,8], index: 2, kind: input, shape index: {}]   ;;  %s586_s3 = inlined_call_operand.hbm [shape: f32[336,128], index: 3, kind: input, shape index: {}]   ;;  %s587_s4 = inlined_call_operand.hbm [shape: f32[2,128], index: 4, kind: output, shape index: {0}]   ;;  %s588_s5 = inlined_call_operand.hbm [shape: f32[16,128], index: 5, kind: output, shape index: {1}]  }
   0x1   :  { %12 = vsyncpa [#allocation6], 0 }
   0x2   :  { %13 = vsyncpa [#allocation9], 0 }
   0x3   :  { %14 = vsyncpa [#allocation4], 0  ;;  %s32_s20 = sshll.u32 %s584_s1, 4  ;;  %s33_s20 = int_to_ptr.hbm [resolvable:$true] %s32_s20 }
   0x4   :  { %15 = vsyncpa [#allocation12], 0  ;;  %s512_s21 = smov [#allocation5]   ;;  %s21_s25 = sshll.u32 %s583_s0, 4  ;;  %s22_s25 = int_to_ptr.hbm [resolvable:$true] %s21_s25 }
   0x5   :  { %s34_s22 = sshll.u32 %s512_s21, 4  ;;  %s513_s26 = smov [#allocation2]   ;;  %s35_s22 = int_to_ptr.vmem [resolvable:$true] %s34_s22 }
   0x6   :  { %37 = dma.hbm_to_vmem [thread:$0]  %s33_s20, 32, %s35_s22, [#allocation6]  }
   0x7   :  { %s23_s27 = sshll.u32 %s513_s26, 4  ;;  %s42_s30 = sshll.u32 %s585_s2, 4  ;;  %s24_s27 = int_to_ptr.vmem [resolvable:$true] %s23_s27  ;;  %s43_s30 = int_to_ptr.hbm [resolvable:$true] %s42_s30 }
   0x8   :  { %26 = dma.hbm_to_vmem [thread:$0]  %s22_s25, 32, %s24_s27, [#allocation3]  }
   0x9   :  { %s514_s1 = smov [#allocation7]   ;;  %s55_s9 = sshll.u32 %s586_s3, 4  ;;  %s56_s9 = int_to_ptr.hbm [resolvable:$true] %s55_s9 }
   0xa   :  { %s44_s6 = sshll.u32 %s514_s1, 4  ;;  %s515_s10 = smov 128   ;;  %s45_s6 = int_to_ptr.vmem [resolvable:$true] %s44_s6 }
   0xb   :  { %s516_s0 = smov 8   ;;  %s517_s11 = smov [#allocation8]  }
   0xc   :  { %50 = dma.hbm_to_vmem [thread:$0]  %s43_s30, 256, %s45_s6, [#allocation6], %s515_s10, %s515_s10, %s516_s0  }
   0xd   :  { %s57_s12 = sshll.u32 %s517_s11, 4  ;;  %s58_s12 = int_to_ptr.vmem [resolvable:$true] %s57_s12 }
   0xe   :  { %63 = dma.hbm_to_vmem [thread:$0]  %s56_s9, 5376, %s58_s12, [#allocation9], %s515_s10, %s515_s10, %s516_s0  }
   0xf   :  { %502 = dma.done.wait [#allocation3], 32  }
  0x10   :  { %503 = vsyncadd [#allocation3], 4294967264 }
  0x11   :  { %504 = dma.done.wait [#allocation6], 288  }
  0x12   :  { %505 = vsyncadd [#allocation6], 4294967008 }
  0x13   :  { %506 = dma.done.wait [#allocation9], 5376  }
  0x14   :  { %507 = vsyncadd [#allocation9], 4294961920  ;;  %v85_v0 = vld [vmem:[#allocation8 + $0x18] sm:$0xff]  ;;  %v84_v1 = vld [vmem:[#allocation8 + $0x10] sm:$0xff]  ;;  %vm86_vm0 = vcmask 130048   ;;  %vm185_vm1 = vcmask 64512  }
  0x15   :  { %104 = vmatpush.msra.mxu0 %v85_v0  ;;  %v83_v2 = vld [vmem:[#allocation5] sm:$0x3]  ;;  %v152_v4 = vld [vmem:[#allocation8 + $0xa0] sm:$0xff]  ;;  %v151_v5 = vld [vmem:[#allocation8 + $0x98] sm:$0xff]  ;;  %s518_s2 = smov [#allocation10]   ;;  %s293_s15 = sshll.u32 %s587_s4, 4  ;;  %s294_s15 = int_to_ptr.hbm [resolvable:$true] %s293_s15 }
  0x16   :  { %v82_v3 = vld [vmem:[#allocation8 + $0x8] sm:$0xff]  ;;  %155 = vmatpush.msra.mxu2 %v152_v4  ;;  %v81_v6 = vld [vmem:[#allocation8] sm:$0xff]  ;;  %v150_v7 = vld [vmem:[#allocation8 + $0x90] sm:$0xff]  ;;  %s291_s3 = sshll.u32 %s518_s2, 4  ;;  %s519_s16 = smov [#allocation11]   ;;  %s292_s3 = int_to_ptr.vmem [resolvable:$true] %s291_s3 }
  0x17   :  { %105 = vmatpush.msra.mxu0 %v84_v1  ;;  %v149_v8 = vld [vmem:[#allocation8 + $0x88] sm:$0xff]  ;;  %v148_v9 = vld [vmem:[#allocation8 + $0x80] sm:$0xff]  ;;  %v147_v11 = vld [vmem:[#allocation8 + $0x78] sm:$0xff]  ;;  %s301_s17 = sshll.u32 %s519_s16, 4  ;;  %s303_s20 = sshll.u32 %s588_s5, 4  ;;  %s302_s17 = int_to_ptr.vmem [resolvable:$true] %s301_s17  ;;  %s304_s20 = int_to_ptr.hbm [resolvable:$true] %s303_s20 }
  0x18   :  { %323 = vmatmul.msk.f32.vlgmr.msra.gmra.mxu0 %vm86_vm0, %v83_v2  ;;  %156 = vmatpush.msra.mxu2 %v151_v5  ;;  %v80_v10 = vld [vmem:[#allocation2] sm:$0x3]  ;;  %v146_v12 = vld [vmem:[#allocation8 + $0x70] sm:$0xff]  ;;  %v144_v14 = vld [vmem:[#allocation8 + $0x60] sm:$0xff] }
  0x19   :  { %127 = vmatpush.msrb.mxu0 %v82_v3  ;;  %v145_v13 = vld [vmem:[#allocation8 + $0x68] sm:$0xff]  ;;  %v143_v15 = vld [vmem:[#allocation8 + $0x58] sm:$0xff]  ;;  %v142_v16 = vld [vmem:[#allocation8 + $0x50] sm:$0xff] }
  0x1a   :  { %157 = vmatpush.msra.mxu2 %v150_v7  ;;  %v141_v17 = vld [vmem:[#allocation8 + $0x48] sm:$0xff]  ;;  %v140_v18 = vld [vmem:[#allocation8 + $0x40] sm:$0xff]  ;;  %v139_v19 = vld [vmem:[#allocation8 + $0x38] sm:$0xff] }
  0x1b   :  { %128 = vmatpush.msrb.mxu0 %v81_v6  ;;  %v182_v20 = vld [vmem:[#allocation8 + $0xb0] sm:$0xff]  ;;  %v137_v23 = vld [vmem:[#allocation8 + $0x28] sm:$0xff]  ;;  %v233_v24 = vld [vmem:[#allocation8 + $0x138] sm:$0xff] }
  0x1c   :  { %158 = vmatpush.msra.mxu2 %v149_v8  ;;  %v180_v21 = vld [vmem:[#allocation7] sm:$0xff]  ;;  %207 = vmatpush.msra.mxu3 %v182_v20  ;;  %v181_v26 = vld [vmem:[#allocation7 + $0x8] sm:$0xff]  ;;  %v231_v27 = vld [vmem:[#allocation8 + $0x128] sm:$0xff] }
  0x1d   :  { %v138_v22 = vld [vmem:[#allocation8 + $0x30] sm:$0xff]  ;;  %326 = vmatmul.msk.f32.vlgmr.msra.gmra.mxu3 %vm185_vm1, %v180_v21  ;;  %234 = vmatpush.msra.mxu1 %v233_v24  ;;  %v230_v28 = vld [vmem:[#allocation8 + $0x120] sm:$0xff]  ;;  %v229_v29 = vld [vmem:[#allocation8 + $0x118] sm:$0xff] }
  0x1e   :  { %159 = vmatpush.msra.mxu2 %v148_v9  ;;  %v232_v25 = vld [vmem:[#allocation8 + $0x130] sm:$0xff]  ;;  %330 = vmatpush.msrb.mxu3 %v233_v24  ;;  %v227_v31 = vld [vmem:[#allocation8 + $0x108] sm:$0xff]  ;;  %v226_v32 = vld [vmem:[#allocation8 + $0x100] sm:$0xff] }
  0x1f   :  { %235 = vmatpush.msra.mxu1 %v232_v25  ;;  %v228_v30 = vld [vmem:[#allocation8 + $0x110] sm:$0xff]  ;;  %v225_v33 = vld [vmem:[#allocation8 + $0xf8] sm:$0xff]  ;;  %v354_v35 = vld [vmem:[#allocation8 + $0x20] ss:$0 sm:$0xff] }
  0x20   :  { %324 = vmatmul.msk.f32.vlgmr.msrb.gmra.mxu0 %vm86_vm0, %v80_v10  ;;  %160 = vmatpush.msra.mxu2 %v147_v11  ;;  %v224_v40 = vld [vmem:[#allocation8 + $0xf0] sm:$0xff]  ;;  %v223_v41 = vld [vmem:[#allocation8 + $0xe8] sm:$0xff]  ;;  %v215_v42 = vld [vmem:[#allocation8 + $0x140] sm:$0xff] }
  0x21   :  { %331 = vmatpush.msrb.mxu3 %v232_v25  ;;  %236 = vmatpush.msra.mxu1 %v231_v27  ;;  %v222_v43 = vld [vmem:[#allocation8 + $0xe0] sm:$0xff]  ;;  %v221_v44 = vld [vmem:[#allocation8 + $0xd8] sm:$0xff]  ;;  %v220_v45 = vld [vmem:[#allocation8 + $0xd0] sm:$0xff] }
  0x22   :  { %161 = vmatpush.msra.mxu2 %v146_v12  ;;  %272 = vmatpush.msra.mxu0 %v215_v42  ;;  %v219_v46 = vld [vmem:[#allocation8 + $0xc8] sm:$0xff]  ;;  %v218_v47 = vld [vmem:[#allocation8 + $0xc0] sm:$0xff]  ;;  %v355_v52 = vld [vmem:[#allocation8 + $0xb8] ss:$0 sm:$0xff] }
  0x23   :  { %332 = vmatpush.msrb.mxu3 %v231_v27  ;;  %237 = vmatpush.msra.mxu1 %v230_v28  ;;  %v356_v49 = vld [vmem:[#allocation8 + $0xa8] ss:$0 sm:$0xff] }
  0x24   :  { %162 = vmatpush.msra.mxu2 %v145_v13  ;;  %v357_v62 = vld [vmem:[#allocation8 + $0x148] ss:$0 sm:$0xff] }
  0x25   :  { %327 = vmatmul.msk.f32.gmra.mxu3 %vm185_vm1, %v181_v26  ;;  %238 = vmatpush.msra.mxu1 %v229_v29 }
  0x26   :  { %163 = vmatpush.msra.mxu2 %v144_v14  ;;  %333 = vmatpush.msrb.mxu3 %v230_v28 }
  0x27   :  { %239 = vmatpush.msra.mxu1 %v228_v30 }
  0x28   :  { %164 = vmatpush.msra.mxu2 %v143_v15  ;;  %334 = vmatpush.msrb.mxu3 %v229_v29 }
  0x29   :  { %240 = vmatpush.msra.mxu1 %v227_v31  ;;  %328 = vmatmul.msk.f32.vlgmr.msra.gmra.mxu0 %vm185_vm1, %v180_v21 }
  0x2a   :  { %165 = vmatpush.msra.mxu2 %v142_v16  ;;  %335 = vmatpush.msrb.mxu3 %v228_v30 }
  0x2b   :  { %241 = vmatpush.msra.mxu1 %v226_v32 }
  0x2c   :  { %166 = vmatpush.msra.mxu2 %v141_v17  ;;  %336 = vmatpush.msrb.mxu3 %v227_v31 }
  0x2d   :  { %242 = vmatpush.msra.mxu1 %v225_v33 }
  0x2e   :  { %167 = vmatpush.msra.mxu2 %v140_v18  ;;  %337 = vmatpush.msrb.mxu3 %v226_v32 }
  0x2f   :  { %243 = vmatpush.msra.mxu1 %v224_v40 }
  0x30   :  { %168 = vmatpush.msra.mxu2 %v139_v19  ;;  %338 = vmatpush.msrb.mxu3 %v225_v33 }
  0x31   :  { %244 = vmatpush.msra.mxu1 %v223_v41  ;;  %329 = vmatmul.msk.f32.gmra.mxu0 %vm185_vm1, %v181_v26 }
  0x32   :  { %169 = vmatpush.msra.mxu2 %v138_v22  ;;  %339 = vmatpush.msrb.mxu3 %v224_v40 }
  0x33   :  { %245 = vmatpush.msra.mxu1 %v222_v43 }
  0x34   :  { %170 = vmatpush.msra.mxu2 %v137_v23  ;;  %340 = vmatpush.msrb.mxu3 %v223_v41 }
  0x35   :  { %246 = vmatpush.msra.mxu1 %v221_v44 }
  0x36   :  { %341 = vmatpush.msrb.mxu3 %v222_v43 }
  0x37   :  { %247 = vmatpush.msra.mxu1 %v220_v45 }
  0x38   :  { %342 = vmatpush.msrb.mxu3 %v221_v44 }
  0x39   :  { %248 = vmatpush.msra.mxu1 %v219_v46 }
  0x3a   :  { %343 = vmatpush.msrb.mxu3 %v220_v45 }
  0x3b   :  { %249 = vmatpush.msra.mxu1 %v218_v47 }
  0x3c   :  { %344 = vmatpush.msrb.mxu3 %v219_v46 }
  0x3e   :  { %345 = vmatpush.msrb.mxu3 %v218_v47 }
  0x95   :  { %v107_v34 = vpop.f32.mrf.mxu0 }
  0x9d   :  { %v130_v36 = vpop.f32.mrf.mxu0 }
  0x9e   :  { %v131_v37 = vadd.f32 %v130_v36, %v107_v34 }
  0xa0   :  { %v135_v38 = vadd.f32 %v354_v35, %v131_v37  ;;  %v209_v48 = vpop.f32.mrf.mxu3 }
  0xa1   :  { %v210_v56 = vadd.f32 %v355_v52, %v209_v48 }
  0xa2   :  { %v136_v39 = vmax.f32 %v135_v38, 0.0 }
  0xa4   :  { %171 = vmatmul.f32.vlgmr.msra.gmra.mxu2 %v136_v39 }
  0xa6   :  { %v274_v61 = vpop.f32.mrf.mxu0 }
  0xa8   :  { %v212_v51 = vpop.f32.mrf.mxu3 }
  0xa9   :  { %v213_v55 = vadd.f32 %v355_v52, %v212_v51 }
  0xae   :  { %v277_v2 = vpop.f32.mrf.mxu0 }
 0x127   :  { %v172_v50 = vpop.f32.mrf.mxu2 }
 0x128   :  { %v173_v53 = vadd.f32 %v356_v49, %v172_v50 }
 0x12a   :  { %v325_v54 = vclamps-f32 %v173_v53, 0.01 }
 0x12c   :  { %177 = vst [vmem:[#allocation10] sm:$0x3] %v325_v54  ;;  %v179_v57 = vperm.slane %v325_v54, 1  ;;  %v178_v58 = vperm.slane %v325_v54, 0 }
 0x12d   :  { %296 = dma.vmem_to_hbm [thread:$0]  %s292_s3, 32, %s294_s15, [#allocation4]  }
 0x12e   :  { %v217_v59 = vmul.f32 %v213_v55, %v179_v57  ;;  %v216_v60 = vmul.f32 %v210_v56, %v178_v58 }
 0x130   :  { %250 = vmatmul.f32.vlgmr.msra.gmra.mxu1 %v216_v60  ;;  %253 = vmatmul.f32.vlgmr.msrb.gmra.mxu3 %v217_v59 }
 0x1ad   :  { %v251_v63 = vpop.f32.mrf.mxu1 }
 0x1ae   :  { %v275_v0 = vadd.f32 %v274_v61, %v251_v63 }
 0x1b0   :  { %v282_v1 = vadd.f32 %v357_v62, %v275_v0 }
 0x1b2   :  { %284 = vst [vmem:[#allocation11] sm:$0xff] %v282_v1 }
 0x1b3   :  { %v254_v3 = vpop.f32.mrf.mxu3 }
 0x1b4   :  { %v278_v4 = vadd.f32 %v277_v2, %v254_v3 }
 0x1b6   :  { %v283_v5 = vadd.f32 %v357_v62, %v278_v4 }
 0x1b8   :  { %285 = vst [vmem:[#allocation11 + $0x8] sm:$0xff] %v283_v5 }
 0x1b9   :  { %309 = dma.vmem_to_hbm [thread:$0]  %s302_s17, 256, %s304_s20, [#allocation12], %s515_s10, %s515_s10, %s516_s0  }
 0x1ba   :  { %508 = dma.done.wait [#allocation4], 32  }
 0x1bb   :  { %509 = vsyncadd [#allocation4], 4294967264 }
 0x1bc   :  { %510 = dma.done.wait [#allocation12], 256  }
 0x1bd   :  { %511 = vsyncadd [#allocation12], 4294967040 }
 0x1be   :  { %318 = vsyncpa [#allocation3], 1 }
 0x1bf   :  { %319 = vsyncpa [#allocation6], 1 }
 0x1c0   :  { %320 = vsyncpa [#allocation9], 1 }
 0x1c1   :  { %321 = vsyncpa [#allocation4], 1 }
 0x1c2   :  { %322 = vsyncpa [#allocation12], 1 }

</bundles_post_ra>
